<compile_context>
chip_gen: v5e
topology: v5e:2x2
jax: 0.10.0
libtpu: 0.0.40
codegen_flags: <defaults>
</compile_context>

<pallas_src>
import functools

import jax
import jax.numpy as jnp
from jax.experimental import pallas as pl
from jax.experimental.pallas import tpu as pltpu


def attack_mlp_kernel(xt_ref, w1_ref, b1_ref, w2_ref, b2_ref, o_ref):
    # Feature-major tile: the batch dimension lives on the 128-lane axis for
    # x, h and y, so every load/store is lane-dense and no transpose is needed.
    xt = xt_ref[...].astype(jnp.bfloat16)        # [D_in, TB]  (no-op for bf16 input)
    w1 = w1_ref[...]                             # [H, D_in]   bf16, VMEM-resident
    w2 = w2_ref[...]                             # [D_out, H]  bf16, VMEM-resident

    # fc1 (transposed): [H, D_in] @ [D_in, TB] -> [H, TB], f32 accumulation on MXU.
    h = jnp.dot(w1, xt, preferred_element_type=jnp.float32)
    # f32 bias (broadcast along lane/batch axis) + ReLU on the VPU.
    h = jnp.maximum(h + b1_ref[...], 0.0)

    # fc2 (transposed): [D_out, H] @ [H, TB] -> [D_out, TB], f32 accumulation.
    y = jnp.dot(w2, h.astype(jnp.bfloat16), preferred_element_type=jnp.float32)
    y = y + b2_ref[...]

    # Lane-dense store, consumer dtype (bf16 by default -> half the output bytes).
    o_ref[...] = y.astype(o_ref.dtype)


def pack_params(w1, b1, w2, b2):
    """PyTorch nn.Linear params -> kernel operands.

    w1: [H, D_in], b1: [H], w2: [D_out, H], b2: [D_out]   (nn.Linear layout)
    Weights stay in their native layout (the transposed compute chain wants
    exactly [H, D_in] and [D_out, H]) and are cast to bf16 for the MXU.
    Biases stay f32 (bit-close to the f32 PyTorch model) as [., 1] columns so
    they broadcast along the lane/batch axis inside the kernel.
    """
    return (w1.astype(jnp.bfloat16),
            b1.astype(jnp.float32)[:, None],
            w2.astype(jnp.bfloat16),
            b2.astype(jnp.float32)[:, None])


@functools.partial(jax.jit, static_argnames=("block_batch", "out_dtype"))
def attack_mlp_forward_t(x_t, w1, b1, w2, b2, *,
                         block_batch=8192, out_dtype=jnp.bfloat16):
    """Feature-major forward.  x_t: [D_in, B]  ->  y_t: [D_out, B].

    Preferred production entry point: producer emits x feature-major (bf16),
    consumer reads y_t directly (softmax/argmax over 2 classes is
    layout-agnostic) -> zero extra HBM transpose passes.
    Note: f32 x is silently cast to bf16 inside the kernel (precision policy).
    """
    d_in, B = x_t.shape
    h_dim, d_in_w = w1.shape
    d_out = w2.shape[0]
    assert d_in_w == d_in and w2.shape[1] == h_dim
    assert b1.shape == (h_dim, 1) and b2.shape == (d_out, 1)
    assert block_batch % 128 == 0

    # One tile for small B; otherwise 128-aligned tiles (lane axis stays dense).
    # block_batch=8192 keeps per-step overhead negligible; at production B keep
    # the grid >= 2 steps so v7x's two TensorCores both get work.
    tb = B if B <= block_batch else block_batch
    grid = (pl.cdiv(B, tb),)

    return pl.pallas_call(
        attack_mlp_kernel,
        out_shape=jax.ShapeDtypeStruct((d_out, B), out_dtype),
        grid=grid,
        in_specs=[
            pl.BlockSpec((d_in, tb), lambda i: (0, i)),       # x streams over batch, lane-dense
            pl.BlockSpec((h_dim, d_in), lambda i: (0, 0)),    # params stay VMEM-resident
            pl.BlockSpec((h_dim, 1), lambda i: (0, 0)),
            pl.BlockSpec((d_out, h_dim), lambda i: (0, 0)),
            pl.BlockSpec((d_out, 1), lambda i: (0, 0)),
        ],
        out_specs=pl.BlockSpec((d_out, tb), lambda i: (0, i)),  # lane-dense output slab
        compiler_params=pltpu.CompilerParams(
            dimension_semantics=("parallel",)),                 # megacore on v7x
    )(x_t, w1, b1, w2, b2)


def attack_mlp_forward(x, w1, b1, w2, b2, *, block_batch=8192, out_dtype=jnp.bfloat16):
    """Batch-major compatibility wrapper: x [B, D_in] -> y [B, D_out].

    The two transposes here are wrapper-side layout plumbing (extra HBM passes
    over tiny 20 B / 4 B rows); use attack_mlp_forward_t in hot paths.
    """
    y_t = attack_mlp_forward_t(x.T, w1, b1, w2, b2,
                               block_batch=block_batch, out_dtype=out_dtype)
    return y_t.T


def init_params(key, input_dim=10, hidden_dim=32, output_dim=2):
    # Deterministic synthetic init (PyTorch nn.Linear layout + uniform fan-in bounds).
    k1, k2, k3, k4 = jax.random.split(key, 4)
    bound1 = input_dim ** -0.5
    bound2 = hidden_dim ** -0.5
    w1 = jax.random.uniform(k1, (hidden_dim, input_dim), jnp.float32, -bound1, bound1)
    b1 = jax.random.uniform(k2, (hidden_dim,), jnp.float32, -bound1, bound1)
    w2 = jax.random.uniform(k3, (output_dim, hidden_dim), jnp.float32, -bound2, bound2)
    b2 = jax.random.uniform(k4, (output_dim,), jnp.float32, -bound2, bound2)
    return w1, b1, w2, b2


if __name__ == "__main__":
    key = jax.random.PRNGKey(0)
    k_x, k_p = jax.random.split(key)

    B, D_in, H, D_out = 256, 10, 32, 2

    # Producer emits x feature-major ([D_in, B]) and bf16: lane-dense input DMA,
    # half the HBM bytes of f32.
    x_t = jax.random.normal(k_x, (D_in, B), jnp.float32).astype(jnp.bfloat16)

    w1f, b1f, w2f, b2f = init_params(k_p, D_in, H, D_out)
    w1, b1, w2, b2 = pack_params(w1f, b1f, w2f, b2f)

    # Preferred path: feature-major in, feature-major out ([D_out, B]).
    y_t = attack_mlp_forward_t(x_t, w1, b1, w2, b2)
    y_t = jax.block_until_ready(y_t)
    assert y_t.shape == (D_out, B)

    # Plain-JAX reference: f32 math on the same bf16-rounded weights/activations.
    xf = x_t.astype(jnp.float32).T                      # [B, D_in]
    w1r = w1.astype(jnp.float32)                        # [H, D_in]
    w2r = w2.astype(jnp.float32)                        # [D_out, H]
    hid = jnp.maximum(
        jnp.dot(xf, w1r.T, precision=jax.lax.Precision.HIGHEST) + b1f, 0.0)
    ref = jnp.dot(hid.astype(jnp.bfloat16).astype(jnp.float32), w2r.T,
                  precision=jax.lax.Precision.HIGHEST) + b2f      # [B, D_out]
    assert jnp.allclose(y_t.astype(jnp.float32).T, ref, atol=3e-2, rtol=3e-2)

    # Batch-major compatibility path (module semantics: x [B, 10] -> y [B, 2]).
    y = attack_mlp_forward(xf.astype(jnp.bfloat16), w1, b1, w2, b2)
    y = jax.block_until_ready(y)
    assert y.shape == (B, D_out)
    assert jnp.allclose(y.astype(jnp.float32), ref, atol=3e-2, rtol=3e-2)

    print("KERNEL_OK")
</pallas_src>

<mosaic_0001>
module attributes {stable_mosaic.version = 11 : i64} {
  func.func @attack_mlp_kernel(%arg0: i32, %arg1: memref<10x256xbf16, #tpu.memory_space<vmem>>, %arg2: memref<32x10xbf16, #tpu.memory_space<vmem>>, %arg3: memref<32x1xf32, #tpu.memory_space<vmem>>, %arg4: memref<2x32xbf16, #tpu.memory_space<vmem>>, %arg5: memref<2x1xf32, #tpu.memory_space<vmem>>, %arg6: memref<2x256xbf16, #tpu.memory_space<vmem>>) attributes {dimension_semantics = [#tpu.dimension_semantics<parallel>], iteration_bounds = array<i64: 1>, scalar_prefetch = 0 : i64, scratch_operands = 0 : i64, tpu.core_type = #tpu.core_type<tc>, window_params = [{transform_indices = @transform_0, window_bounds = array<i64: 10, 256>}, {pipeline_mode = #tpu.pipeline_mode<synchronous>, transform_indices = @transform_1, window_bounds = array<i64: 32, 10>}, {pipeline_mode = #tpu.pipeline_mode<synchronous>, transform_indices = @transform_2, window_bounds = array<i64: 32, 1>}, {pipeline_mode = #tpu.pipeline_mode<synchronous>, transform_indices = @transform_3, window_bounds = array<i64: 2, 32>}, {pipeline_mode = #tpu.pipeline_mode<synchronous>, transform_indices = @transform_4, window_bounds = array<i64: 2, 1>}, {transform_indices = @transform_5, window_bounds = array<i64: 2, 256>}]} {
    %c0 = arith.constant 0 : index
    %c0_0 = arith.constant 0 : index
    %0 = vector.load %arg1[%c0, %c0_0] : memref<10x256xbf16, #tpu.memory_space<vmem>>, vector<10x256xbf16>
    %c0_1 = arith.constant 0 : index
    %c0_2 = arith.constant 0 : index
    %1 = vector.load %arg2[%c0_1, %c0_2] : memref<32x10xbf16, #tpu.memory_space<vmem>>, vector<32x10xbf16>
    %c0_3 = arith.constant 0 : index
    %c0_4 = arith.constant 0 : index
    %2 = vector.load %arg4[%c0_3, %c0_4] : memref<2x32xbf16, #tpu.memory_space<vmem>>, vector<2x32xbf16>
    %cst = arith.constant dense<0.000000e+00> : vector<32x256xf32>
    %3 = tpu.matmul %1, %0, %cst {dimension_numbers = #tpu.dot_dimension_numbers<[1], [0], [0], [1], [0, 0, 1, 1], [], []>} : vector<32x10xbf16>, vector<10x256xbf16>, vector<32x256xf32> -> vector<32x256xf32>
    %c0_5 = arith.constant 0 : index
    %c0_6 = arith.constant 0 : index
    %4 = vector.load %arg3[%c0_5, %c0_6] : memref<32x1xf32, #tpu.memory_space<vmem>>, vector<32x1xf32>
    %5 = vector.broadcast %4 : vector<32x1xf32> to vector<32x256xf32>
    %6 = arith.addf %3, %5 : vector<32x256xf32>
    %cst_7 = arith.constant 0.000000e+00 : f32
    %7 = vector.broadcast %cst_7 : f32 to vector<32x256xf32>
    %8 = arith.maximumf %6, %7 : vector<32x256xf32>
    %9 = arith.truncf %8 : vector<32x256xf32> to vector<32x256xbf16>
    %cst_8 = arith.constant dense<0.000000e+00> : vector<2x256xf32>
    %10 = tpu.matmul %2, %9, %cst_8 {dimension_numbers = #tpu.dot_dimension_numbers<[1], [0], [0], [1], [0, 0, 1, 1], [], []>} : vector<2x32xbf16>, vector<32x256xbf16>, vector<2x256xf32> -> vector<2x256xf32>
    %c0_9 = arith.constant 0 : index
    %c0_10 = arith.constant 0 : index
    %11 = vector.load %arg5[%c0_9, %c0_10] : memref<2x1xf32, #tpu.memory_space<vmem>>, vector<2x1xf32>
    %12 = vector.broadcast %11 : vector<2x1xf32> to vector<2x256xf32>
    %13 = arith.addf %10, %12 : vector<2x256xf32>
    %14 = arith.truncf %13 : vector<2x256xf32> to vector<2x256xbf16>
    %c0_11 = arith.constant 0 : index
    %c0_12 = arith.constant 0 : index
    %15 = vector.load %arg6[%c0_11, %c0_12] : memref<2x256xbf16, #tpu.memory_space<vmem>>, vector<2x256xbf16>
    tpu.vector_store %arg6[%c0_11, %c0_12], %14 {strides = array<i32>} : memref<2x256xbf16, #tpu.memory_space<vmem>>, vector<2x256xbf16>,
    return
  }
  func.func @transform_0(%arg0: i32) -> (i32, i32) {
    %c0_i32 = arith.constant 0 : i32
    %c0_i32_0 = arith.constant 0 : i32
    return %c0_i32, %arg0 : i32, i32
  }
  func.func @transform_1(%arg0: i32) -> (i32, i32) {
    %c0_i32 = arith.constant 0 : i32
    %c0_i32_0 = arith.constant 0 : i32
    %c0_i32_1 = arith.constant 0 : i32
    return %c0_i32, %c0_i32_0 : i32, i32
  }
  func.func @transform_2(%arg0: i32) -> (i32, i32) {
    %c0_i32 = arith.constant 0 : i32
    %c0_i32_0 = arith.constant 0 : i32
    %c0_i32_1 = arith.constant 0 : i32
    return %c0_i32, %c0_i32_0 : i32, i32
  }
  func.func @transform_3(%arg0: i32) -> (i32, i32) {
    %c0_i32 = arith.constant 0 : i32
    %c0_i32_0 = arith.constant 0 : i32
    %c0_i32_1 = arith.constant 0 : i32
    return %c0_i32, %c0_i32_0 : i32, i32
  }
  func.func @transform_4(%arg0: i32) -> (i32, i32) {
    %c0_i32 = arith.constant 0 : i32
    %c0_i32_0 = arith.constant 0 : i32
    %c0_i32_1 = arith.constant 0 : i32
    return %c0_i32, %c0_i32_0 : i32, i32
  }
  func.func @transform_5(%arg0: i32) -> (i32, i32) {
    %c0_i32 = arith.constant 0 : i32
    %c0_i32_0 = arith.constant 0 : i32
    return %c0_i32, %arg0 : i32, i32
  }
}

</mosaic_0001>

<bundles_post_ra>
// kernel: attack_mlp_forward_t.1
= control target key start
LH: loop header
LB: loop body
LE: loop exit
PB: predicated region body
PF: predicated region fallthrough
CT: control target
= control target key end

     0   :  { %vm78_vm0 = vcmask 1044480   ;;  %v253_v6 = vmov 0   ;;  %s326_s0 = inlined_call_operand.vmem [shape: bf16[10,256], index: 0, kind: input, shape index: {}]   ;;  %s327_s1 = inlined_call_operand.vmem [shape: bf16[32,10], index: 1, kind: input, shape index: {}]   ;;  %s328_s2 = inlined_call_operand.vmem [shape: f32[32,1], index: 2, kind: input, shape index: {}]   ;;  %s329_s3 = inlined_call_operand.vmem [shape: bf16[2,32], index: 3, kind: input, shape index: {}]   ;;  %s330_s4 = inlined_call_operand.vmem [shape: f32[2,1], index: 4, kind: input, shape index: {}]   ;;  %s331_s5 = inlined_call_operand.hbm [shape: bf16[2,256], index: 5, kind: output, shape index: {}]  }
   0x1   :  { %v206_v0 = vld [vmem:[%s326_s0] sm:$0xf]  ;;  %v219_v1 = vld [vmem:[%s326_s0 + $0x4] sm:$0x10]  ;;  %v218_v3 = vld [vmem:[%s326_s0 + $0x4] sm:$0xf]  ;;  %225 = vset.pattern.permute.xlu1 %v253_v6  ;;  %224 = vset.pattern.permute.xlu0 %v253_v6 }
   0x2   :  { %v207_v2 = vor.u32 %v219_v1, %v206_v0  ;;  %v208_v4 = vld [vmem:[%s326_s0 + $0x8] sm:$0x10]  ;;  %v29_v7 = vld [vmem:[%s328_s2] sm:$0xff]  ;;  %v31_v8 = vld [vmem:[%s328_s2 + $0x10] sm:$0xff] }
   0x3   :  { %v211_v5 = vor.u32 %v218_v3, %v208_v4  ;;  %v220_v10 = vld [vmem:[%s327_s1] sm:$0xff]  ;;  %35 = vperm.xlu1 %225, %v29_v7   ;;  %45 = vperm.xlu0 %224, %v31_v8  }
   0x4   :  { %v80_v9 = vsel %vm78_vm0, %v207_v2, 0 }
   0x5   :  { %10 = vsyncpa [#allocation3], 0  ;;  %92 = vmatpush.bf16.msra.mxu0 %v80_v9  ;;  %v83_v11 = vsel %vm78_vm0, %v211_v5, 0  ;;  %vm71_vm1 = vcmask 80896   ;;  %226 = vset.pattern.permute.xlu2 %v253_v6  ;;  %v30_v12 = vld [vmem:[%s328_s2 + $0x8] sm:$0xff]  ;;  %v32_v13 = vld [vmem:[%s328_s2 + $0x18] sm:$0xff] }
   0x6   :  { %111 = vmatpush.bf16.msra.mxu1 %v83_v11  ;;  %v221_v14 = vld [vmem:[%s327_s1 + $0x8] sm:$0xff]  ;;  %v135_v17 = vld [vmem:[%s330_s4] sm:$0x3]  ;;  %vm141_vm2 = vcmask 261120   ;;  %s254_s4 = smov [#allocation2]   ;;  %s187_s17 = sshll.u32 %s331_s5, 4  ;;  %s188_s17 = int_to_ptr.hbm [resolvable:$true] %s187_s17 }
   0x7   :  { %138 = vperm.xlu2 %226, %v135_v17   ;;  %v28_v48 = vld [vmem:[%s329_s3] sm:$0x1]  ;;  %s185_s14 = sshll.u32 %s254_s4, 4  ;;  %vm174_vm3 = vcmask 1040384   ;;  %s186_s14 = int_to_ptr.vmem [resolvable:$true] %s185_s14 }
   0x8   :  { %212 = vmatmul.msk.bf16.vlgmr.msra.gmra.mxu0 %vm71_vm1, %v220_v10 }
   0x9   :  { %214 = vmatmul.msk.bf16.vlgmr.msra.gmra.mxu1 %vm71_vm1, %v220_v10 }
   0xb   :  { %40 = vperm.xlu1 %225, %v30_v12   ;;  %50 = vperm.xlu0 %224, %v32_v13  }
  0x18   :  { %213 = vmatmul.msk.bf16.gmra.mxu0 %vm71_vm1, %v221_v14 }
  0x19   :  { %215 = vmatmul.msk.bf16.gmra.mxu1 %vm71_vm1, %v221_v14 }
  0x61   :  { %v139_v49 = vpop.permute.xlu2 %138 }
  0x75   :  { %v36_v20 = vpop.permute.xlu1 %35  ;;  %v46_v21 = vpop.permute.xlu0 %45 }
  0x7d   :  { %v41_v24 = vpop.permute.xlu1 %40  ;;  %v51_v26 = vpop.permute.xlu0 %50 }
  0x85   :  { %v94_v15 = vpop.f32.mrf.mxu0 }
  0x86   :  { %v113_v16 = vpop.f32.mrf.mxu1  ;;  %v95_v34 = vadd.f32 %v94_v15, %v36_v20 }
  0x87   :  { %v114_v37 = vadd.f32 %v113_v16, %v36_v20 }
  0x88   :  { %v123_v44 = vmax.f32 %v95_v34, 0.0 }
  0x89   :  { %v124_v45 = vmax.f32 %v114_v37, 0.0 }
  0x8d   :  { %v96_v18 = vpop.f32.mrf.mxu0 }
  0x8e   :  { %v115_v19 = vpop.f32.mrf.mxu1  ;;  %v97_v29 = vadd.f32 %v96_v18, %v41_v24 }
  0x8f   :  { %v116_v32 = vadd.f32 %v115_v19, %v41_v24 }
  0x90   :  { %v125_v40 = vmax.f32 %v97_v29, 0.0 }
  0x91   :  { %v126_v42 = vmax.f32 %v116_v32, 0.0 }
  0x92   :  { %v131_v46 = vpack.c.bf16 %v125_v40, %v123_v44 }
  0x93   :  { %v132_v47 = vpack.c.bf16 %v126_v42, %v124_v45 }
  0x95   :  { %v99_v22 = vpop.f32.mrf.mxu0 }
  0x96   :  { %v118_v23 = vpop.f32.mrf.mxu1  ;;  %v100_v25 = vadd.f32 %v99_v22, %v46_v21 }
  0x97   :  { %v119_v27 = vadd.f32 %v118_v23, %v46_v21 }
  0x98   :  { %v127_v35 = vmax.f32 %v100_v25, 0.0 }
  0x99   :  { %v128_v38 = vmax.f32 %v119_v27, 0.0 }
  0x9d   :  { %v101_v28 = vpop.f32.mrf.mxu0 }
  0x9e   :  { %v102_v30 = vadd.f32 %v101_v28, %v51_v26  ;;  %v120_v31 = vpop.f32.mrf.mxu1 }
  0x9f   :  { %v121_v33 = vadd.f32 %v120_v31, %v51_v26 }
  0xa0   :  { %v129_v36 = vmax.f32 %v102_v30, 0.0 }
  0xa1   :  { %v130_v39 = vmax.f32 %v121_v33, 0.0 }
  0xa2   :  { %v133_v41 = vpack.c.bf16 %v129_v36, %v127_v35 }
  0xa3   :  { %v134_v43 = vpack.c.bf16 %v130_v39, %v128_v38 }
  0xa4   :  { %151 = vmatpush.bf16.msra.mxu2 %v133_v41 }
  0xa5   :  { %164 = vmatpush.bf16.msra.mxu3 %v134_v43 }
  0xa8   :  { %152 = vmatpush.bf16.msra.mxu2 %v131_v46 }
  0xa9   :  { %165 = vmatpush.bf16.msra.mxu3 %v132_v47 }
  0xab   :  { %216 = vmatmul.msk.bf16.vlgmr.msra.gmra.mxu2 %vm141_vm2, %v28_v48 }
  0xac   :  { %217 = vmatmul.msk.bf16.vlgmr.msra.gmra.mxu3 %vm141_vm2, %v28_v48 }
 0x12e   :  { %v154_v50 = vpop.f32.mrf.mxu2 }
 0x12f   :  { %v155_v51 = vadd.f32 %v154_v50, %v139_v49  ;;  %v167_v52 = vpop.f32.mrf.mxu3 }
 0x130   :  { %v168_v53 = vadd.f32 %v167_v52, %v139_v49 }
 0x132   :  { %v171_v54 = vpack.c.bf16 %v168_v53, %v155_v51 }
 0x134   :  { %v173_v55 = vrot.slane %v171_v54, 3 }
 0x136   :  { %v156_v56 = vpop.f32.mrf.mxu2  ;;  %v177_v57 = vsel %vm174_vm3, %v171_v54, %v173_v55 }
 0x137   :  { %v169_v58 = vpop.f32.mrf.mxu3  ;;  %179 = vst [vmem:[#allocation2] sm:$0x3] %v177_v57 }
 0x138   :  { %190 = dma.vmem_to_hbm [thread:$0]  %s186_s14, 32, %s188_s17, [#allocation3]  }
 0x139   :  { %251 = dma.done.wait [#allocation3], 32  }
 0x13a   :  { %252 = vsyncadd [#allocation3], 4294967264 }
 0x13b   :  { %195 = vsyncpa [#allocation3], 1 }

</bundles_post_ra>
